<compile_context>
chip_gen: v6e
topology: v6e:2x2x1
jax: 0.10.0
libtpu: 0.0.40
codegen_flags: <defaults>
</compile_context>

<pallas_src>
import functools

import jax
import jax.numpy as jnp
from jax import lax
from jax.experimental import pallas as pl
from jax.experimental.pallas import tpu as pltpu

C1 = 64          # conv1 out channels
C2 = 128         # conv2 out channels
KSIZE = 3        # conv kernel size
BN_EPS = 1e-5    # PyTorch BatchNorm1d default eps


def keystroke_cnn_kernel(x_ref, pm_ref, nm_ref,
                         w1p_ref, w1c_ref, w1n_ref, t1_ref,
                         w2p_ref, w2c_ref, w2n_ref, t2_ref,
                         fcw_ref, fcb_ref, out_ref, *, seq_len):
    # x_ref block: (TB * L, F) f32 -- TB samples, rows of one sample contiguous.
    N = x_ref.shape[0]
    L = seq_len
    TB = N // L
    x = x_ref[...]                                           # (N, F) f32

    # Precomputed per-row boundary masks (1.0 where the neighbour row exists
    # inside the same sample, else 0.0).  They zero the conv padding rows and
    # stop shifts from bleeding across sample boundaries inside the block.
    pmask = pm_ref[...]                                      # (N, 1) f32
    nmask = nm_ref[...]                                      # (N, 1) f32

    def conv_bn_relu(v, wp_ref, wc_ref, wn_ref, t_ref):
        """Conv1d(k=3,p=1) + folded bias/BN + ReLU as 3 accumulated bf16 dots."""
        cin = v.shape[-1]
        zrow = jnp.zeros((1, cin), jnp.float32)
        # v_prev[i] = v[i-1] (0 at each sample's first row)
        v_prev = jnp.concatenate([zrow, v[:N - 1, :]], axis=0) * pmask
        # v_next[i] = v[i+1] (0 at each sample's last row)
        v_next = jnp.concatenate([v[1:, :], zrow], axis=0) * nmask
        h = jnp.dot(v_prev.astype(jnp.bfloat16), wp_ref[...],
                    preferred_element_type=jnp.float32)
        h = h + jnp.dot(v.astype(jnp.bfloat16), wc_ref[...],
                        preferred_element_type=jnp.float32)
        h = h + jnp.dot(v_next.astype(jnp.bfloat16), wn_ref[...],
                        preferred_element_type=jnp.float32)
        return jnp.maximum(h + t_ref[...], 0.0)               # f32

    h = conv_bn_relu(x, w1p_ref, w1c_ref, w1n_ref, t1_ref)    # (N, 64)
    g = conv_bn_relu(h, w2p_ref, w2c_ref, w2n_ref, t2_ref)    # (N, 128)
    # dropout: identity in eval mode.

    # Global average pool over L per sample (1/L is folded into fcw), then fc
    # into a lane-dense (multiple-of-128) padded output.
    pooled = jnp.sum(g.reshape(TB, L, C2), axis=1)            # (TB, 128)
    out_ref[...] = (jnp.dot(pooled.astype(jnp.bfloat16), fcw_ref[...],
                            preferred_element_type=jnp.float32)
                    + fcb_ref[...])                           # (TB, NCP)


def keystroke_cnn_forward(x, params, *, batch_tile=128, vmem_limit_bytes=None):
    """x: (B, L, F) float32.  Returns logits (B, num_classes)."""
    B, L, F = x.shape
    NC = params["fc_w"].shape[1]
    NCP = max(128, pl.cdiv(NC, 128) * 128)        # lane-dense fc output width

    # ---- fold conv bias + eval-mode BN into the conv weights (exact) ----
    s1 = params["bn1_gamma"] / jnp.sqrt(params["bn1_var"] + BN_EPS)
    t1 = (params["b1"] - params["bn1_mean"]) * s1 + params["bn1_beta"]
    s2 = params["bn2_gamma"] / jnp.sqrt(params["bn2_var"] + BN_EPS)
    t2 = (params["b2"] - params["bn2_mean"]) * s2 + params["bn2_beta"]

    # Torch conv weight (OC, IC, K) -> per-tap (IC, OC) matrices, BN scale
    # folded, cast to bf16 for the MXU.  Tap 0 multiplies x[l-1] (padding=1).
    def tap(w, s, k):
        return (w[:, :, k].T * s[None, :]).astype(jnp.bfloat16)

    w1p, w1c, w1n = tap(params["w1"], s1, 0), tap(params["w1"], s1, 1), tap(params["w1"], s1, 2)
    w2p, w2c, w2n = tap(params["w2"], s2, 0), tap(params["w2"], s2, 1), tap(params["w2"], s2, 2)
    t1 = t1.reshape(1, C1).astype(jnp.float32)
    t2 = t2.reshape(1, C2).astype(jnp.float32)

    # fc: pad to lane-dense width, fold the 1/L pooling scale, bf16 weight.
    fcw = (jnp.zeros((C2, NCP), jnp.float32)
           .at[:, :NC].set(params["fc_w"].astype(jnp.float32) / L)
           ).astype(jnp.bfloat16)
    fcb = jnp.zeros((1, NCP), jnp.float32).at[0, :NC].set(
        params["fc_b"].astype(jnp.float32))

    # ---- batch tiling: TB samples per grid step ----
    TB = B if B <= batch_tile else batch_tile     # batch_tile kept a mult of 8
    # Keep the grid >= 2 when the batch allows, so v7x's two TensorCores both
    # get work on the "parallel" axis (no-op on v5e/v6e, and for tiny batches).
    if B >= 16 and TB >= B:
        TB = max(8, (B // 2) // 8 * 8)
    B_pad = pl.cdiv(B, TB) * TB
    xf = x.astype(jnp.float32)
    if B_pad != B:
        xf = jnp.concatenate(
            [xf, jnp.zeros((B_pad - B, L, F), jnp.float32)], axis=0)
    x2 = xf.reshape(B_pad * L, F)                 # rows of a sample contiguous

    # Per-row boundary masks for one block (identical for every grid step
    # because each block holds whole samples); stay resident in VMEM.
    lidx = jnp.arange(L)
    pmask = jnp.tile((lidx != 0).astype(jnp.float32), TB).reshape(TB * L, 1)
    nmask = jnp.tile((lidx != L - 1).astype(jnp.float32), TB).reshape(TB * L, 1)

    kernel = functools.partial(keystroke_cnn_kernel, seq_len=L)

    def const_spec(a):
        # Grid-invariant full block: stays resident in VMEM across steps.
        return pl.BlockSpec(a.shape, lambda i, _nd=a.ndim: (0,) * _nd)

    out = pl.pallas_call(
        kernel,
        out_shape=jax.ShapeDtypeStruct((B_pad, NCP), jnp.float32),
        grid=(B_pad // TB,),
        in_specs=[
            pl.BlockSpec((TB * L, F), lambda i: (i, 0)),
            const_spec(pmask), const_spec(nmask),
            const_spec(w1p), const_spec(w1c), const_spec(w1n), const_spec(t1),
            const_spec(w2p), const_spec(w2c), const_spec(w2n), const_spec(t2),
            const_spec(fcw), const_spec(fcb),
        ],
        out_specs=pl.BlockSpec((TB, NCP), lambda i: (i, 0)),
        compiler_params=pltpu.CompilerParams(
            dimension_semantics=("parallel",),
            vmem_limit_bytes=vmem_limit_bytes),
    )(x2, pmask, nmask, w1p, w1c, w1n, t1, w2p, w2c, w2n, t2, fcw, fcb)

    return out[:B, :NC]


def reference_forward(x, params):
    """Pure-JAX reference mimicking the PyTorch forward (eval mode, f32)."""
    xt = jnp.transpose(x, (0, 2, 1))                          # (B, F, L)  NCL
    y = lax.conv_general_dilated(xt, params["w1"], (1,), ((1, 1),),
                                 dimension_numbers=("NCH", "OIH", "NCH"))
    y = y + params["b1"][None, :, None]
    y = ((y - params["bn1_mean"][None, :, None])
         / jnp.sqrt(params["bn1_var"][None, :, None] + BN_EPS)
         * params["bn1_gamma"][None, :, None] + params["bn1_beta"][None, :, None])
    y = jnp.maximum(y, 0.0)
    y = lax.conv_general_dilated(y, params["w2"], (1,), ((1, 1),),
                                 dimension_numbers=("NCH", "OIH", "NCH"))
    y = y + params["b2"][None, :, None]
    y = ((y - params["bn2_mean"][None, :, None])
         / jnp.sqrt(params["bn2_var"][None, :, None] + BN_EPS)
         * params["bn2_gamma"][None, :, None] + params["bn2_beta"][None, :, None])
    y = jnp.maximum(y, 0.0)
    pooled = jnp.mean(y, axis=2)                              # (B, 128)
    return pooled @ params["fc_w"] + params["fc_b"]


def init_params(key, num_features, num_classes):
    ks = jax.random.split(key, 12)
    p = {
        "w1": 0.1 * jax.random.normal(ks[0], (C1, num_features, KSIZE), jnp.float32),
        "b1": 0.1 * jax.random.normal(ks[1], (C1,), jnp.float32),
        "bn1_gamma": 1.0 + 0.1 * jax.random.normal(ks[2], (C1,), jnp.float32),
        "bn1_beta": 0.1 * jax.random.normal(ks[3], (C1,), jnp.float32),
        "bn1_mean": 0.1 * jax.random.normal(ks[4], (C1,), jnp.float32),
        "bn1_var": 0.5 + jnp.abs(jax.random.normal(ks[5], (C1,), jnp.float32)) * 0.5,
        "w2": 0.1 * jax.random.normal(ks[6], (C2, C1, KSIZE), jnp.float32),
        "b2": 0.1 * jax.random.normal(ks[7], (C2,), jnp.float32),
        "bn2_gamma": 1.0 + 0.1 * jax.random.normal(ks[8], (C2,), jnp.float32),
        "bn2_beta": 0.1 * jax.random.normal(ks[9], (C2,), jnp.float32),
        "bn2_mean": 0.1 * jax.random.normal(ks[10], (C2,), jnp.float32),
        "bn2_var": 0.5 + jnp.abs(jax.random.normal(ks[11], (C2,), jnp.float32)) * 0.5,
    }
    kfc = jax.random.split(ks[0], 2)
    p["fc_w"] = 0.1 * jax.random.normal(kfc[0], (C2, num_classes), jnp.float32)
    p["fc_b"] = 0.1 * jax.random.normal(kfc[1], (num_classes,), jnp.float32)
    return p


if __name__ == "__main__":
    B, L, F, NUM_CLASSES = 2, 16, 8, 2     # (batch, seq_length, num_features)
    key = jax.random.PRNGKey(0)
    kx, kp = jax.random.split(key)
    x = jax.random.normal(kx, (B, L, F), jnp.float32)
    params = init_params(kp, F, NUM_CLASSES)

    out = jax.block_until_ready(keystroke_cnn_forward(x, params))
    ref = jax.block_until_ready(reference_forward(x, params))
    assert out.shape == (B, NUM_CLASSES)
    # bf16 MXU operands with f32 accumulation -> relaxed tolerance.
    assert jnp.allclose(out, ref, atol=2e-2, rtol=2e-2), (out, ref)
    print("KERNEL_OK")
</pallas_src>

<mosaic_0001>
module attributes {stable_mosaic.version = 11 : i64} {
  func.func @keystroke_cnn_kernel(%arg0: i32, %arg1: memref<32x8xf32, #tpu.memory_space<vmem>>, %arg2: memref<32x1xf32, #tpu.memory_space<vmem>>, %arg3: memref<32x1xf32, #tpu.memory_space<vmem>>, %arg4: memref<8x64xbf16, #tpu.memory_space<vmem>>, %arg5: memref<8x64xbf16, #tpu.memory_space<vmem>>, %arg6: memref<8x64xbf16, #tpu.memory_space<vmem>>, %arg7: memref<1x64xf32, #tpu.memory_space<vmem>>, %arg8: memref<64x128xbf16, #tpu.memory_space<vmem>>, %arg9: memref<64x128xbf16, #tpu.memory_space<vmem>>, %arg10: memref<64x128xbf16, #tpu.memory_space<vmem>>, %arg11: memref<1x128xf32, #tpu.memory_space<vmem>>, %arg12: memref<128x128xbf16, #tpu.memory_space<vmem>>, %arg13: memref<1x128xf32, #tpu.memory_space<vmem>>, %arg14: memref<2x128xf32, #tpu.memory_space<vmem>>) attributes {dimension_semantics = [#tpu.dimension_semantics<parallel>], iteration_bounds = array<i64: 1>, scalar_prefetch = 0 : i64, scratch_operands = 0 : i64, tpu.core_type = #tpu.core_type<tc>, window_params = [{transform_indices = @transform_0, window_bounds = array<i64: 32, 8>}, {pipeline_mode = #tpu.pipeline_mode<synchronous>, transform_indices = @transform_1, window_bounds = array<i64: 32, 1>}, {pipeline_mode = #tpu.pipeline_mode<synchronous>, transform_indices = @transform_2, window_bounds = array<i64: 32, 1>}, {pipeline_mode = #tpu.pipeline_mode<synchronous>, transform_indices = @transform_3, window_bounds = array<i64: 8, 64>}, {pipeline_mode = #tpu.pipeline_mode<synchronous>, transform_indices = @transform_4, window_bounds = array<i64: 8, 64>}, {pipeline_mode = #tpu.pipeline_mode<synchronous>, transform_indices = @transform_5, window_bounds = array<i64: 8, 64>}, {pipeline_mode = #tpu.pipeline_mode<synchronous>, transform_indices = @transform_6, window_bounds = array<i64: 1, 64>}, {pipeline_mode = #tpu.pipeline_mode<synchronous>, transform_indices = @transform_7, window_bounds = array<i64: 64, 128>}, {pipeline_mode = #tpu.pipeline_mode<synchronous>, transform_indices = @transform_8, window_bounds = array<i64: 64, 128>}, {pipeline_mode = #tpu.pipeline_mode<synchronous>, transform_indices = @transform_9, window_bounds = array<i64: 64, 128>}, {pipeline_mode = #tpu.pipeline_mode<synchronous>, transform_indices = @transform_10, window_bounds = array<i64: 1, 128>}, {pipeline_mode = #tpu.pipeline_mode<synchronous>, transform_indices = @transform_11, window_bounds = array<i64: 128, 128>}, {pipeline_mode = #tpu.pipeline_mode<synchronous>, transform_indices = @transform_12, window_bounds = array<i64: 1, 128>}, {transform_indices = @transform_13, window_bounds = array<i64: 2, 128>}]} {
    %c0 = arith.constant 0 : index
    %c0_0 = arith.constant 0 : index
    %0 = vector.load %arg1[%c0, %c0_0] : memref<32x8xf32, #tpu.memory_space<vmem>>, vector<32x8xf32>
    %c0_1 = arith.constant 0 : index
    %c0_2 = arith.constant 0 : index
    %1 = vector.load %arg2[%c0_1, %c0_2] : memref<32x1xf32, #tpu.memory_space<vmem>>, vector<32x1xf32>
    %c0_3 = arith.constant 0 : index
    %c0_4 = arith.constant 0 : index
    %2 = vector.load %arg3[%c0_3, %c0_4] : memref<32x1xf32, #tpu.memory_space<vmem>>, vector<32x1xf32>
    %cst = arith.constant 0.000000e+00 : f32
    %3 = vector.broadcast %cst : f32 to vector<1x8xf32>
    %4 = vector.extract_strided_slice %0 {offsets = [0, 0], sizes = [31, 8], strides = [1, 1]} : vector<32x8xf32> to vector<31x8xf32>
    %5 = tpu.concatenate %3, %4 in 0 : vector<1x8xf32>, vector<31x8xf32> -> vector<32x8xf32>
    %6 = vector.broadcast %1 : vector<32x1xf32> to vector<32x8xf32>
    %7 = arith.mulf %5, %6 : vector<32x8xf32>
    %8 = vector.extract_strided_slice %0 {offsets = [1, 0], sizes = [31, 8], strides = [1, 1]} : vector<32x8xf32> to vector<31x8xf32>
    %9 = tpu.concatenate %8, %3 in 0 : vector<31x8xf32>, vector<1x8xf32> -> vector<32x8xf32>
    %10 = vector.broadcast %2 : vector<32x1xf32> to vector<32x8xf32>
    %11 = arith.mulf %9, %10 : vector<32x8xf32>
    %12 = arith.truncf %7 : vector<32x8xf32> to vector<32x8xbf16>
    %c0_5 = arith.constant 0 : index
    %c0_6 = arith.constant 0 : index
    %13 = vector.load %arg4[%c0_5, %c0_6] : memref<8x64xbf16, #tpu.memory_space<vmem>>, vector<8x64xbf16>
    %cst_7 = arith.constant dense<0.000000e+00> : vector<32x64xf32>
    %14 = tpu.matmul %12, %13, %cst_7 {dimension_numbers = #tpu.dot_dimension_numbers<[1], [0], [0], [1], [0, 0, 1, 1], [], []>} : vector<32x8xbf16>, vector<8x64xbf16>, vector<32x64xf32> -> vector<32x64xf32>
    %15 = arith.truncf %0 : vector<32x8xf32> to vector<32x8xbf16>
    %c0_8 = arith.constant 0 : index
    %c0_9 = arith.constant 0 : index
    %16 = vector.load %arg5[%c0_8, %c0_9] : memref<8x64xbf16, #tpu.memory_space<vmem>>, vector<8x64xbf16>
    %cst_10 = arith.constant dense<0.000000e+00> : vector<32x64xf32>
    %17 = tpu.matmul %15, %16, %cst_10 {dimension_numbers = #tpu.dot_dimension_numbers<[1], [0], [0], [1], [0, 0, 1, 1], [], []>} : vector<32x8xbf16>, vector<8x64xbf16>, vector<32x64xf32> -> vector<32x64xf32>
    %18 = arith.addf %14, %17 : vector<32x64xf32>
    %19 = arith.truncf %11 : vector<32x8xf32> to vector<32x8xbf16>
    %c0_11 = arith.constant 0 : index
    %c0_12 = arith.constant 0 : index
    %20 = vector.load %arg6[%c0_11, %c0_12] : memref<8x64xbf16, #tpu.memory_space<vmem>>, vector<8x64xbf16>
    %cst_13 = arith.constant dense<0.000000e+00> : vector<32x64xf32>
    %21 = tpu.matmul %19, %20, %cst_13 {dimension_numbers = #tpu.dot_dimension_numbers<[1], [0], [0], [1], [0, 0, 1, 1], [], []>} : vector<32x8xbf16>, vector<8x64xbf16>, vector<32x64xf32> -> vector<32x64xf32>
    %22 = arith.addf %18, %21 : vector<32x64xf32>
    %c0_14 = arith.constant 0 : index
    %c0_15 = arith.constant 0 : index
    %23 = vector.load %arg7[%c0_14, %c0_15] : memref<1x64xf32, #tpu.memory_space<vmem>>, vector<1x64xf32>
    %24 = vector.broadcast %23 : vector<1x64xf32> to vector<32x64xf32>
    %25 = arith.addf %22, %24 : vector<32x64xf32>
    %cst_16 = arith.constant 0.000000e+00 : f32
    %26 = vector.broadcast %cst_16 : f32 to vector<32x64xf32>
    %27 = arith.maximumf %25, %26 : vector<32x64xf32>
    %cst_17 = arith.constant 0.000000e+00 : f32
    %28 = vector.broadcast %cst_17 : f32 to vector<1x64xf32>
    %29 = vector.extract_strided_slice %27 {offsets = [0, 0], sizes = [31, 64], strides = [1, 1]} : vector<32x64xf32> to vector<31x64xf32>
    %30 = tpu.concatenate %28, %29 in 0 : vector<1x64xf32>, vector<31x64xf32> -> vector<32x64xf32>
    %31 = vector.broadcast %1 : vector<32x1xf32> to vector<32x64xf32>
    %32 = arith.mulf %30, %31 : vector<32x64xf32>
    %33 = vector.extract_strided_slice %27 {offsets = [1, 0], sizes = [31, 64], strides = [1, 1]} : vector<32x64xf32> to vector<31x64xf32>
    %34 = tpu.concatenate %33, %28 in 0 : vector<31x64xf32>, vector<1x64xf32> -> vector<32x64xf32>
    %35 = vector.broadcast %2 : vector<32x1xf32> to vector<32x64xf32>
    %36 = arith.mulf %34, %35 : vector<32x64xf32>
    %37 = arith.truncf %32 : vector<32x64xf32> to vector<32x64xbf16>
    %c0_18 = arith.constant 0 : index
    %c0_19 = arith.constant 0 : index
    %38 = vector.load %arg8[%c0_18, %c0_19] : memref<64x128xbf16, #tpu.memory_space<vmem>>, vector<64x128xbf16>
    %cst_20 = arith.constant dense<0.000000e+00> : vector<32x128xf32>
    %39 = tpu.matmul %37, %38, %cst_20 {dimension_numbers = #tpu.dot_dimension_numbers<[1], [0], [0], [1], [0, 0, 1, 1], [], []>} : vector<32x64xbf16>, vector<64x128xbf16>, vector<32x128xf32> -> vector<32x128xf32>
    %40 = arith.truncf %27 : vector<32x64xf32> to vector<32x64xbf16>
    %c0_21 = arith.constant 0 : index
    %c0_22 = arith.constant 0 : index
    %41 = vector.load %arg9[%c0_21, %c0_22] : memref<64x128xbf16, #tpu.memory_space<vmem>>, vector<64x128xbf16>
    %cst_23 = arith.constant dense<0.000000e+00> : vector<32x128xf32>
    %42 = tpu.matmul %40, %41, %cst_23 {dimension_numbers = #tpu.dot_dimension_numbers<[1], [0], [0], [1], [0, 0, 1, 1], [], []>} : vector<32x64xbf16>, vector<64x128xbf16>, vector<32x128xf32> -> vector<32x128xf32>
    %43 = arith.addf %39, %42 : vector<32x128xf32>
    %44 = arith.truncf %36 : vector<32x64xf32> to vector<32x64xbf16>
    %c0_24 = arith.constant 0 : index
    %c0_25 = arith.constant 0 : index
    %45 = vector.load %arg10[%c0_24, %c0_25] : memref<64x128xbf16, #tpu.memory_space<vmem>>, vector<64x128xbf16>
    %cst_26 = arith.constant dense<0.000000e+00> : vector<32x128xf32>
    %46 = tpu.matmul %44, %45, %cst_26 {dimension_numbers = #tpu.dot_dimension_numbers<[1], [0], [0], [1], [0, 0, 1, 1], [], []>} : vector<32x64xbf16>, vector<64x128xbf16>, vector<32x128xf32> -> vector<32x128xf32>
    %47 = arith.addf %43, %46 : vector<32x128xf32>
    %c0_27 = arith.constant 0 : index
    %c0_28 = arith.constant 0 : index
    %48 = vector.load %arg11[%c0_27, %c0_28] : memref<1x128xf32, #tpu.memory_space<vmem>>, vector<1x128xf32>
    %49 = vector.broadcast %48 : vector<1x128xf32> to vector<32x128xf32>
    %50 = arith.addf %47, %49 : vector<32x128xf32>
    %cst_29 = arith.constant 0.000000e+00 : f32
    %51 = vector.broadcast %cst_29 : f32 to vector<32x128xf32>
    %52 = arith.maximumf %50, %51 : vector<32x128xf32>
    %53 = vector.shape_cast %52 : vector<32x128xf32> to vector<2x16x128xf32>
    %cst_30 = arith.constant dense<0.000000e+00> : vector<2x128xf32>
    %54 = vector.multi_reduction <add>, %53, %cst_30 [1] : vector<2x16x128xf32> to vector<2x128xf32>
    %55 = arith.truncf %54 : vector<2x128xf32> to vector<2x128xbf16>
    %c0_31 = arith.constant 0 : index
    %c0_32 = arith.constant 0 : index
    %56 = vector.load %arg12[%c0_31, %c0_32] : memref<128x128xbf16, #tpu.memory_space<vmem>>, vector<128x128xbf16>
    %cst_33 = arith.constant dense<0.000000e+00> : vector<2x128xf32>
    %57 = tpu.matmul %55, %56, %cst_33 {dimension_numbers = #tpu.dot_dimension_numbers<[1], [0], [0], [1], [0, 0, 1, 1], [], []>} : vector<2x128xbf16>, vector<128x128xbf16>, vector<2x128xf32> -> vector<2x128xf32>
    %c0_34 = arith.constant 0 : index
    %c0_35 = arith.constant 0 : index
    %58 = vector.load %arg13[%c0_34, %c0_35] : memref<1x128xf32, #tpu.memory_space<vmem>>, vector<1x128xf32>
    %59 = vector.broadcast %58 : vector<1x128xf32> to vector<2x128xf32>
    %60 = arith.addf %57, %59 : vector<2x128xf32>
    %c0_36 = arith.constant 0 : index
    %c0_37 = arith.constant 0 : index
    %61 = vector.load %arg14[%c0_36, %c0_37] : memref<2x128xf32, #tpu.memory_space<vmem>>, vector<2x128xf32>
    tpu.vector_store %arg14[%c0_36, %c0_37], %60 {strides = array<i32>} : memref<2x128xf32, #tpu.memory_space<vmem>>, vector<2x128xf32>,
    return
  }
  func.func @transform_0(%arg0: i32) -> (i32, i32) {
    %c0_i32 = arith.constant 0 : i32
    %c0_i32_0 = arith.constant 0 : i32
    return %arg0, %c0_i32 : i32, i32
  }
  func.func @transform_1(%arg0: i32) -> (i32, i32) {
    %c0_i32 = arith.constant 0 : i32
    %c0_i32_0 = arith.constant 0 : i32
    %c0_i32_1 = arith.constant 0 : i32
    return %c0_i32, %c0_i32_0 : i32, i32
  }
  func.func @transform_2(%arg0: i32) -> (i32, i32) {
    %c0_i32 = arith.constant 0 : i32
    %c0_i32_0 = arith.constant 0 : i32
    %c0_i32_1 = arith.constant 0 : i32
    return %c0_i32, %c0_i32_0 : i32, i32
  }
  func.func @transform_3(%arg0: i32) -> (i32, i32) {
    %c0_i32 = arith.constant 0 : i32
    %c0_i32_0 = arith.constant 0 : i32
    %c0_i32_1 = arith.constant 0 : i32
    return %c0_i32, %c0_i32_0 : i32, i32
  }
  func.func @transform_4(%arg0: i32) -> (i32, i32) {
    %c0_i32 = arith.constant 0 : i32
    %c0_i32_0 = arith.constant 0 : i32
    %c0_i32_1 = arith.constant 0 : i32
    return %c0_i32, %c0_i32_0 : i32, i32
  }
  func.func @transform_5(%arg0: i32) -> (i32, i32) {
    %c0_i32 = arith.constant 0 : i32
    %c0_i32_0 = arith.constant 0 : i32
    %c0_i32_1 = arith.constant 0 : i32
    return %c0_i32, %c0_i32_0 : i32, i32
  }
  func.func @transform_6(%arg0: i32) -> (i32, i32) {
    %c0_i32 = arith.constant 0 : i32
    %c0_i32_0 = arith.constant 0 : i32
    %c0_i32_1 = arith.constant 0 : i32
    return %c0_i32, %c0_i32_0 : i32, i32
  }
  func.func @transform_7(%arg0: i32) -> (i32, i32) {
    %c0_i32 = arith.constant 0 : i32
    %c0_i32_0 = arith.constant 0 : i32
    %c0_i32_1 = arith.constant 0 : i32
    return %c0_i32, %c0_i32_0 : i32, i32
  }
  func.func @transform_8(%arg0: i32) -> (i32, i32) {
    %c0_i32 = arith.constant 0 : i32
    %c0_i32_0 = arith.constant 0 : i32
    %c0_i32_1 = arith.constant 0 : i32
    return %c0_i32, %c0_i32_0 : i32, i32
  }
  func.func @transform_9(%arg0: i32) -> (i32, i32) {
    %c0_i32 = arith.constant 0 : i32
    %c0_i32_0 = arith.constant 0 : i32
    %c0_i32_1 = arith.constant 0 : i32
    return %c0_i32, %c0_i32_0 : i32, i32
  }
  func.func @transform_10(%arg0: i32) -> (i32, i32) {
    %c0_i32 = arith.constant 0 : i32
    %c0_i32_0 = arith.constant 0 : i32
    %c0_i32_1 = arith.constant 0 : i32
    return %c0_i32, %c0_i32_0 : i32, i32
  }
  func.func @transform_11(%arg0: i32) -> (i32, i32) {
    %c0_i32 = arith.constant 0 : i32
    %c0_i32_0 = arith.constant 0 : i32
    %c0_i32_1 = arith.constant 0 : i32
    return %c0_i32, %c0_i32_0 : i32, i32
  }
  func.func @transform_12(%arg0: i32) -> (i32, i32) {
    %c0_i32 = arith.constant 0 : i32
    %c0_i32_0 = arith.constant 0 : i32
    %c0_i32_1 = arith.constant 0 : i32
    return %c0_i32, %c0_i32_0 : i32, i32
  }
  func.func @transform_13(%arg0: i32) -> (i32, i32) {
    %c0_i32 = arith.constant 0 : i32
    %c0_i32_0 = arith.constant 0 : i32
    return %arg0, %c0_i32 : i32, i32
  }
}

</mosaic_0001>

<bundles_post_ra>
// kernel: tpu_custom_call.1
= control target key start
LH: loop header
LB: loop body
LE: loop exit
PB: predicated region body
PF: predicated region fallthrough
CT: control target
= control target key end

     0   :  { %18 = vsyncpa [#allocation3], 0  ;;  %s1330_s0 = inlined_call_operand.vmem [shape: f32[32,8], index: 0, kind: input, shape index: {}]   ;;  %s1331_s1 = inlined_call_operand.vmem [shape: f32[32,1], index: 1, kind: input, shape index: {}]   ;;  %s1332_s2 = inlined_call_operand.vmem [shape: f32[32,1], index: 2, kind: input, shape index: {}]   ;;  %s1333_s3 = inlined_call_operand.vmem [shape: bf16[8,64], index: 3, kind: input, shape index: {}]   ;;  %s1334_s4 = inlined_call_operand.vmem [shape: bf16[8,64], index: 4, kind: input, shape index: {}]   ;;  %s1335_s5 = inlined_call_operand.vmem [shape: bf16[8,64], index: 5, kind: input, shape index: {}]   ;;  %s1336_s6 = inlined_call_operand.vmem [shape: f32[1,64], index: 6, kind: input, shape index: {}]   ;;  %s1337_s7 = inlined_call_operand.vmem [shape: bf16[64,128], index: 7, kind: input, shape index: {}]   ;;  %s1338_s8 = inlined_call_operand.hbm [shape: bf16[64,128], index: 8, kind: input, shape index: {}]   ;;  %s1339_s9 = inlined_call_operand.hbm [shape: bf16[64,128], index: 9, kind: input, shape index: {}]   ;;  %s1340_s10 = inlined_call_operand.vmem [shape: f32[1,128], index: 10, kind: input, shape index: {}]   ;;  %s1341_s11 = inlined_call_operand.vmem [shape: bf16[128,128], index: 11, kind: input, shape index: {}]   ;;  %s1342_s12 = inlined_call_operand.vmem [shape: f32[1,128], index: 12, kind: input, shape index: {}]   ;;  %s1343_s13 = inlined_call_operand.hbm [shape: f32[2,128], index: 13, kind: output, shape index: {}]  }
   0x1   :  { %19 = vsyncpa [#allocation6], 0 }
   0x2   :  { %20 = vsyncpa [#allocation4], 0  ;;  %s1087_s25 = smov [#allocation2]  }
   0x3   :  { %s42_s26 = sshll.u32 %s1087_s25, 4  ;;  %s43_s26 = int_to_ptr.vmem [resolvable:$true] %s42_s26 }
   0x4   :  { %s1029_s27 = scalar_lea.vmem %s43_s26, 512  ;;  %p1034_p1 = scmp.lt.s32.totalorder %s43_s26, %s43_s26 }
   0x5   :  { %p1030_p0 = scmp.ne.s32.totalorder %s43_s26, %s1029_s27  ;;  %p1035_p2 = scmp.lt.s32.totalorder %s1029_s27, %s1029_s27 }
   0x7   :  { %p1036_p3 = por %p1035_p2, %p1034_p1 }
   0x9   :  { %p1037_p4 = pnand %p1036_p3, %p1030_p0 }
   0xb   :  { %1040 = shalt.err (!%p1037_p4)
}
   0xc   :  { %s1088_s28 = smov 64   ;;  %s1089_s29 = smov 4  }
   0xd   :  { %48 = dma.hbm_to_vmem [thread:$0]  %s1338_s8, 512, %s43_s26, [#allocation3], %s1088_s28, %s1088_s28, %s1089_s29  }
   0xe   :  { %s1090_s15 = smov [#allocation5]  }
   0xf   :  { %s54_s16 = sshll.u32 %s1090_s15, 4  ;;  %s55_s16 = int_to_ptr.vmem [resolvable:$true] %s54_s16 }
  0x10   :  { %s1049_s17 = scalar_lea.vmem %s55_s16, 512  ;;  %p1054_p6 = scmp.lt.s32.totalorder %s55_s16, %s55_s16 }
  0x11   :  { %p1050_p5 = scmp.ne.s32.totalorder %s55_s16, %s1049_s17  ;;  %p1055_p7 = scmp.lt.s32.totalorder %s1049_s17, %s1049_s17 }
  0x13   :  { %p1056_p8 = por %p1055_p7, %p1054_p6 }
  0x15   :  { %p1057_p9 = pnand %p1056_p8, %p1050_p5 }
  0x17   :  { %1060 = shalt.err (!%p1057_p9)
}
  0x18   :  { %60 = dma.hbm_to_vmem [thread:$0]  %s1339_s9, 512, %s55_s16, [#allocation6], %s1088_s28, %s1088_s28, %s1089_s29  }
  0x19   :  { %1081 = dma.done.wait [#allocation3], 512  }
  0x1a   :  { %1082 = vsyncadd [#allocation3], 4294966784 }
  0x1b   :  { %1083 = dma.done.wait [#allocation6], 512  }
  0x1c   :  { %1084 = vsyncadd [#allocation6], 4294966784  ;;  %v1091_v0 = vmov 0   ;;  %v80_v1 = vld [vmem:[%s1331_s1 + $0x10] sm:$0xff]  ;;  %v78_v2 = vld [vmem:[%s1331_s1] sm:$0xff]  ;;  %vm177_vm0 = vcmask 1043456  }
  0x1d   :  { %1000 = vset.pattern.permute.xlu1 %v1091_v0  ;;  %999 = vset.pattern.permute.xlu0 %v1091_v0  ;;  %v81_v3 = vld [vmem:[%s1331_s1 + $0x18] sm:$0xff]  ;;  %v79_v4 = vld [vmem:[%s1331_s1 + $0x8] sm:$0xff]  ;;  %v169_v5 = vld [vmem:[%s1334_s4] sm:$0xf]  ;;  %vm90_vm1 = vcmask 1040384   ;;  %vm170_vm2 = vcmask 64512  }
  0x1e   :  { %115 = vperm.xlu1 %1000, %v80_v1   ;;  %105 = vperm.xlu0 %999, %v78_v2   ;;  %v179_v6 = vsel %vm177_vm0, %v169_v5, 0  ;;  %v75_v7 = vld [vmem:[%s1330_s0 + $0x8] sm:$0xff]  ;;  %v76_v8 = vld [vmem:[%s1330_s0 + $0x10] sm:$0xff]  ;;  %v74_v9 = vld [vmem:[%s1330_s0] sm:$0xff]  ;;  %vm127_vm3 = vcmask 1046528   ;;  %vm448_vm4 = vcmask 523264  }
  0x1f   :  { %988 = vmatprep.subr.msk.bf16.mxu1 %vm177_vm0, %v169_v5  ;;  %v92_v10 = vrot.slane %v75_v7, 7  ;;  %v94_v11 = vrot.slane %v76_v8, 7  ;;  %v91_v12 = vrot.slane %v74_v9, 7  ;;  %v167_v13 = vpack.c.bf16 %v75_v7, %v74_v9  ;;  %v77_v14 = vld [vmem:[%s1330_s0 + $0x18] sm:$0xff]  ;;  %v166_v15 = vld [vmem:[%s1333_s3] sm:$0xf] }
  0x20   :  { %915 = vmatpush3.bf16.msra.mxu1 %v179_v6  ;;  %v83_v16 = vld [vmem:[%s1332_s2 + $0x8] sm:$0xff]  ;;  %v168_v17 = vpack.c.bf16 %v77_v14, %v76_v8  ;;  %v96_v18 = vrot.slane %v77_v14, 7  ;;  %v237_v19 = vsel %vm177_vm0, %v166_v15, 0  ;;  %v129_v20 = vrot.slane %v75_v7, 1  ;;  %v82_v21 = vld [vmem:[%s1332_s2] sm:$0xff]  ;;  %v85_v28 = vld [vmem:[%s1332_s2 + $0x18] sm:$0xff] }
  0x21   :  { %v95_v22 = vsel %vm90_vm1, %v92_v10, %v94_v11  ;;  %916 = vmatprep.mubr.msk.bf16.mxu1 %vm170_vm2, %v167_v13  ;;  %v93_v23 = vsel %vm90_vm1, %v91_v12, %v92_v10  ;;  %989 = vmatprep.subr.msk.bf16.mxu1 %vm177_vm0, %v166_v15  ;;  %v131_v24 = vrot.slane %v76_v8, 1  ;;  %v128_v26 = vrot.slane %v74_v9, 1  ;;  %v290_v30 = vld [vmem:[%s1335_s5] sm:$0xf]  ;;  %v84_v31 = vld [vmem:[%s1332_s2 + $0x10] sm:$0xff]  ;;  %v1001_v57 = vld [vmem:[#allocation2 + $0x18] sm:$0xff]  }
  0x22   :  { %120 = vperm.xlu1 %1000, %v81_v3   ;;  %110 = vperm.xlu0 %999, %v79_v4   ;;  %v97_v25 = vsel %vm90_vm1, %v94_v11, %v96_v18  ;;  %v133_v27 = vrot.slane %v77_v14, 1  ;;  %v298_v34 = vsel %vm177_vm0, %v290_v30, 0  ;;  %v102_v37 = vsel %vm90_vm1, 0.0, %v91_v12  ;;  %v1002_v58 = vld [vmem:[#allocation2 + $0x10] sm:$0xff]   ;;  %v1003_v59 = vld [vmem:[%s1337_s7 + $0x18] sm:$0xff]   ;;  %v1004_v60 = vld [vmem:[#allocation2 + $0x8] sm:$0xff]  }
  0x23   :  { %917 = vmatmul.mubr.msk.bf16.vlgmr.msra.gmra.mxu1 %vm170_vm2, %v168_v17  ;;  %v132_v29 = vsel %vm127_vm3, %v129_v20, %v131_v24  ;;  %v130_v32 = vsel %vm127_vm3, %v128_v26, %v129_v20  ;;  %990 = vmatprep.subr.msk.bf16.mxu0 %vm177_vm0, %v290_v30  ;;  %v1005_v61 = vld [vmem:[%s1337_s7 + $0x10] sm:$0xff]   ;;  %v1006_v62 = vld [vmem:[#allocation2] sm:$0xff]   ;;  %v1007_v63 = vld [vmem:[%s1337_s7 + $0x8] sm:$0xff]   ;;  %vm1093_vm5 = vmmov 0   ;;  %vm734_vm6 = vcmask 1041409   ;;  %s1094_s5 = smov [#allocation7]  }
  0x24   :  { %921 = vmatpush3.bf16.msra.mxu1 %v237_v19  ;;  %v134_v33 = vsel %vm127_vm3, %v131_v24, %v133_v27  ;;  %927 = vmatpush3.bf16.msra.mxu0 %v298_v34  ;;  %v139_v50 = vsel %vm127_vm3, %v133_v27, 0.0  ;;  %v1008_v0 = vld [vmem:[#allocation5 + $0x18] sm:$0xff]   ;;  %v1009_v1 = vld [vmem:[%s1337_s7] sm:$0xff]   ;;  %s833_s25 = sshll.u32 %s1094_s5, 4  ;;  %s834_s25 = int_to_ptr.vmem [resolvable:$true] %s833_s25 }
  0x25   :  { %932 = vmatprep.subr.bf16.mxu1 %v1001_v57  ;;  %944 = vmatprep.subr.bf16.mxu0 %v1003_v59  ;;  %v849_v11 = vld [vmem:[%s1336_s6] ss:$0 sm:$0xff]  ;;  %s1061_s26 = scalar_lea.vmem %s834_s25, 32  ;;  %p1066_p11 = scmp.lt.s32.totalorder %s834_s25, %s834_s25 }
  0x26   :  { %147 = vperm.xlu1 %1000, %v83_v16   ;;  %142 = vperm.xlu0 %999, %v82_v21   ;;  %p1062_p10 = scmp.ne.s32.totalorder %s834_s25, %s1061_s26  ;;  %p1067_p12 = scmp.lt.s32.totalorder %s1061_s26, %s1061_s26 }
  0x28   :  { %p1068_p13 = por %p1067_p12, %p1066_p11 }
  0x2a   :  { %157 = vperm.xlu1 %1000, %v85_v28   ;;  %152 = vperm.xlu0 %999, %v84_v31   ;;  %p1069_p0 = pnand %p1068_p13, %p1062_p10 }
  0x99   :  { %v1230_v35 = vpop.permute.xlu1 %115  ;;  %v1232_v36 = vpop.permute.xlu0 %105 }
  0x9a   :  { %v125_v40 = vmul.f32 %v1230_v35, %v95_v22  ;;  %v123_v41 = vmul.f32 %v1232_v36, %v102_v37 }
  0x9d   :  { %v1235_v38 = vpop.permute.xlu1 %120  ;;  %v1237_v39 = vpop.permute.xlu0 %110 }
  0x9e   :  { %v126_v42 = vmul.f32 %v1235_v38, %v97_v25  ;;  %v124_v43 = vmul.f32 %v1237_v39, %v93_v23 }
  0xa0   :  { %v165_v44 = vpack.c.bf16 %v126_v42, %v125_v40  ;;  %v164_v45 = vpack.c.bf16 %v124_v43, %v123_v41 }
  0xa1   :  { %v1243_v46 = vpop.permute.xlu1 %147  ;;  %v1245_v47 = vpop.permute.xlu0 %142 }
  0xa2   :  { %v161_v48 = vmul.f32 %v1243_v46, %v132_v29  ;;  %v160_v49 = vmul.f32 %v1245_v47, %v130_v32  ;;  %922 = vmatprep.mubr.msk.bf16.mxu1 %vm170_vm2, %v164_v45 }
  0xa3   :  { %923 = vmatmul.mubr.msk.bf16.vlgmr.msra.gmra.mxu1 %vm170_vm2, %v165_v44 }
  0xa4   :  { %v288_v51 = vpack.c.bf16 %v161_v48, %v160_v49  ;;  %933 = vmatpush3.bf16.msra.mxu1 %v1001_v57 }
  0xa5   :  { %v1252_v52 = vpop.permute.xlu1 %157  ;;  %v1254_v53 = vpop.permute.xlu0 %152  ;;  %934 = vmatprep.subr.bf16.mxu1 %v1002_v58 }
  0xa6   :  { %v163_v54 = vmul.f32 %v1252_v52, %v139_v50  ;;  %v162_v55 = vmul.f32 %v1254_v53, %v134_v33  ;;  %928 = vmatprep.mubr.msk.bf16.mxu0 %vm170_vm2, %v288_v51  ;;  %v1010_v50 = vld [vmem:[#allocation5 + $0x10] sm:$0xff]  }
  0xa8   :  { %v289_v56 = vpack.c.bf16 %v163_v54, %v162_v55  ;;  %935 = vmatpush3.bf16.msra.mxu1 %v1002_v58 }
  0xa9   :  { %936 = vmatprep.subr.bf16.mxu1 %v1004_v60 }
  0xaa   :  { %929 = vmatmul.mubr.msk.bf16.vlgmr.msra.gmra.mxu0 %vm170_vm2, %v289_v56 }
  0xab   :  { %945 = vmatpush3.bf16.msra.mxu0 %v1003_v59 }
  0xac   :  { %937 = vmatpush3.bf16.msra.mxu1 %v1004_v60  ;;  %946 = vmatprep.subr.bf16.mxu0 %v1005_v61 }
  0xad   :  { %938 = vmatprep.subr.bf16.mxu1 %v1006_v62 }
  0xaf   :  { %947 = vmatpush3.bf16.msra.mxu0 %v1005_v61 }
  0xb0   :  { %939 = vmatpush3.bf16.msra.mxu1 %v1006_v62  ;;  %948 = vmatprep.subr.bf16.mxu0 %v1007_v63 }
  0xb1   :  { %956 = vmatprep.subr.bf16.mxu1 %v1008_v0 }
  0xb3   :  { %949 = vmatpush3.bf16.msra.mxu0 %v1007_v63 }
  0xb4   :  { %950 = vmatprep.subr.bf16.mxu0 %v1009_v1 }
  0xb7   :  { %951 = vmatpush3.bf16.msra.mxu0 %v1009_v1 }
  0xe3   :  { %v918_v2 = vpop.f32.mrf.mxu1 }
  0xe5   :  { %v215_v3 = vpop.f32.mrf.mxu1 }
  0xe7   :  { %v919_v4 = vpop.f32.mrf.mxu1 }
  0xe9   :  { %v218_v5 = vpop.f32.mrf.mxu1 }
 0x163   :  { %v924_v6 = vpop.f32.mrf.mxu1 }
 0x164   :  { %v282_v8 = vadd.f32 %v924_v6, %v918_v2  ;;  %v1013_v2 = vld [vmem:[%s1341_s11 + $0x38] sm:$0xff]   ;;  %v1018_v6 = vld [vmem:[%s1341_s11 + $0x10] sm:$0xff]  }
 0x165   :  { %v273_v7 = vpop.f32.mrf.mxu1 }
 0x166   :  { %v274_v12 = vadd.f32 %v273_v7, %v215_v3  ;;  %v1092_v3 = vmov 0.0   ;;  %v1019_v7 = vld [vmem:[%s1341_s11 + $0x8] sm:$0xff]  }
 0x167   :  { %v925_v9 = vpop.f32.mrf.mxu1  ;;  %968 = vmatprep.subr.bf16.mxu0 %v1092_v3 }
 0x168   :  { %v285_v15 = vadd.f32 %v925_v9, %v919_v4  ;;  %v1014_v4 = vld [vmem:[%s1341_s11 + $0x30] sm:$0xff]  }
 0x169   :  { %v276_v16 = vpop.f32.mrf.mxu1 }
 0x16a   :  { %v930_v10 = vpop.f32.mrf.mxu0  ;;  %v277_v22 = vadd.f32 %v276_v16, %v218_v5  ;;  %v1017_v5 = vld [vmem:[%s1341_s11 + $0x18] sm:$0xff]  }
 0x16b   :  { %v351_v13 = vadd.f32 %v930_v10, %v282_v8  ;;  %v1020_v8 = vld [vmem:[%s1341_s11] sm:$0xff]  }
 0x16c   :  { %v334_v14 = vpop.f32.mrf.mxu0 }
 0x16d   :  { %v362_v17 = vadd.f32 %v849_v11, %v351_v13  ;;  %v349_v18 = vadd.f32 %v334_v14, %v274_v12 }
 0x16e   :  { %v931_v19 = vpop.f32.mrf.mxu0 }
 0x16f   :  { %v360_v20 = vadd.f32 %v849_v11, %v349_v18  ;;  %v352_v21 = vadd.f32 %v931_v19, %v285_v15  ;;  %v366_v24 = vmax.f32 %v362_v17, 0.0 }
 0x170   :  { %v337_v23 = vpop.f32.mrf.mxu0 }
 0x171   :  { %v364_v25 = vmax.f32 %v360_v20, 0.0  ;;  %v363_v26 = vadd.f32 %v849_v11, %v352_v21  ;;  %v350_v27 = vadd.f32 %v337_v23, %v277_v22  ;;  %v375_v31 = vrot.slane %v366_v24, 7  ;;  %v868_v21 = vld [vmem:[%s1340_s10] ss:$0 sm:$0xff] }
 0x172   :  { %v391_v40 = vrot.slane %v366_v24, 1 }
 0x173   :  { %v372_v28 = vrot.slane %v364_v25, 7  ;;  %v367_v29 = vmax.f32 %v363_v26, 0.0  ;;  %v361_v30 = vadd.f32 %v849_v11, %v350_v27  ;;  %v388_v42 = vrot.slane %v364_v25, 1 }
 0x175   :  { %v377_v32 = vrot.slane %v367_v29, 7  ;;  %v365_v33 = vmax.f32 %v361_v30, 0.0  ;;  %v383_v34 = vsel %vm90_vm1, 0.0, %v372_v28  ;;  %v415_v43 = vpack.c.bf16 %v367_v29, %v366_v24 }
 0x176   :  { %v384_v54 = vmul.f32 %v383_v34, %v1232_v36  ;;  %v393_v62 = vrot.slane %v367_v29, 1 }
 0x177   :  { %v378_v37 = vsel %vm90_vm1, %v375_v31, %v377_v32  ;;  %v373_v41 = vrot.slane %v365_v33, 7  ;;  %v389_v44 = vrot.slane %v365_v33, 1  ;;  %v414_v45 = vpack.c.bf16 %v365_v33, %v364_v25 }
 0x178   :  { %v387_v48 = vmul.f32 %v378_v37, %v1235_v38 }
 0x179   :  { %v376_v49 = vsel %vm90_vm1, %v373_v41, %v375_v31  ;;  %v374_v51 = vsel %vm90_vm1, %v372_v28, %v373_v41  ;;  %940 = vmatprep.mubr.msk.bf16.mxu1 %vm448_vm4, %v414_v45  ;;  %v390_v57 = vsel %vm127_vm3, %v388_v42, %v389_v44  ;;  %v392_v58 = vsel %vm127_vm3, %v389_v44, %v391_v40 }
 0x17a   :  { %v386_v55 = vmul.f32 %v376_v49, %v1230_v35  ;;  %v385_v56 = vmul.f32 %v374_v51, %v1237_v39  ;;  %941 = vmatmul.mubr.msk.bf16.vlgmr.msra.gmra.mxu1 %vm448_vm4, %v415_v43  ;;  %v400_v38 = vmul.f32 %v390_v57, %v1245_v47  ;;  %v401_v59 = vmul.f32 %v392_v58, %v1243_v46  ;;  %v1011_v35 = vld [vmem:[#allocation5 + $0x8] sm:$0xff]   ;;  %v1012_v39 = vld [vmem:[#allocation5] sm:$0xff]  }
 0x17b   :  { %957 = vmatpush3.bf16.msra.mxu1 %v1008_v0  ;;  %v394_v47 = vsel %vm127_vm3, %v391_v40, %v393_v62  ;;  %v399_v46 = vsel %vm127_vm3, %v393_v62, 0.0 }
 0x17c   :  { %v404_v60 = vpack.c.bf16 %v385_v56, %v384_v54  ;;  %v405_v61 = vpack.c.bf16 %v387_v48, %v386_v55  ;;  %958 = vmatprep.subr.bf16.mxu1 %v1010_v50  ;;  %v583_v36 = vpack.c.bf16 %v401_v59, %v400_v38  ;;  %v402_v63 = vmul.f32 %v394_v47, %v1254_v53  ;;  %v1016_v53 = vld [vmem:[%s1341_s11 + $0x20] sm:$0xff]  }
 0x17d   :  { %v403_v0 = vmul.f32 %v399_v46, %v1252_v52  ;;  %v1015_v52 = vld [vmem:[%s1341_s11 + $0x28] sm:$0xff]  }
 0x17e   :  { %952 = vmatprep.mubr.msk.bf16.mxu0 %vm448_vm4, %v404_v60  ;;  %964 = vmatprep.mubr.msk.bf16.mxu1 %vm448_vm4, %v583_v36 }
 0x17f   :  { %953 = vmatmul.mubr.msk.bf16.vlgmr.msra.gmra.mxu0 %vm448_vm4, %v405_v61  ;;  %959 = vmatpush3.bf16.msra.mxu1 %v1010_v50  ;;  %v584_v1 = vpack.c.bf16 %v403_v0, %v402_v63 }
 0x180   :  { %960 = vmatprep.subr.bf16.mxu1 %v1011_v35  ;;  %969 = vmatpush3.bf16.msra.mxu0 %v1013_v2 }
 0x181   :  { %970 = vmatprep.subr.bf16.mxu0 %v1092_v3  ;;  %984 = vmatprep.mubr.msk.bf16.mxu0 %vm1093_vm5, %v1092_v3 }
 0x183   :  { %961 = vmatpush3.bf16.msra.mxu1 %v1011_v35 }
 0x184   :  { %962 = vmatprep.subr.bf16.mxu1 %v1012_v39  ;;  %971 = vmatpush3.bf16.msra.mxu0 %v1014_v4 }
 0x185   :  { %972 = vmatprep.subr.bf16.mxu0 %v1092_v3 }
 0x187   :  { %963 = vmatpush3.bf16.msra.mxu1 %v1012_v39  ;;  %v869_v39 = vld [vmem:[%s1342_s12] ss:$0 sm:$0xff] }
 0x188   :  { %973 = vmatpush3.bf16.msra.mxu0 %v1015_v52 }
 0x189   :  { %974 = vmatprep.subr.bf16.mxu0 %v1092_v3 }
 0x18a   :  { %965 = vmatmul.mubr.msk.bf16.vlgmr.msra.gmra.mxu1 %vm448_vm4, %v584_v1 }
 0x18c   :  { %975 = vmatpush3.bf16.msra.mxu0 %v1016_v53 }
 0x18d   :  { %976 = vmatprep.subr.bf16.mxu0 %v1092_v3 }
 0x190   :  { %977 = vmatpush3.bf16.msra.mxu0 %v1017_v5 }
 0x191   :  { %978 = vmatprep.subr.bf16.mxu0 %v1092_v3 }
 0x194   :  { %979 = vmatpush3.bf16.msra.mxu0 %v1018_v6 }
 0x195   :  { %980 = vmatprep.subr.bf16.mxu0 %v1092_v3 }
 0x198   :  { %981 = vmatpush3.bf16.msra.mxu0 %v1019_v7 }
 0x199   :  { %982 = vmatprep.subr.bf16.mxu0 %v1092_v3 }
 0x19c   :  { %983 = vmatpush3.bf16.msra.mxu0 %v1020_v8 }
 0x23a   :  { %v942_v9 = vpop.f32.mrf.mxu1 }
 0x23c   :  { %v489_v10 = vpop.f32.mrf.mxu1 }
 0x23e   :  { %v943_v12 = vpop.f32.mrf.mxu1 }
 0x23f   :  { %v954_v11 = vpop.f32.mrf.mxu0 }
 0x240   :  { %v492_v14 = vpop.f32.mrf.mxu1  ;;  %v577_v16 = vadd.f32 %v954_v11, %v942_v9 }
 0x241   :  { %v568_v13 = vpop.f32.mrf.mxu0 }
 0x242   :  { %v569_v18 = vadd.f32 %v568_v13, %v489_v10 }
 0x243   :  { %v955_v15 = vpop.f32.mrf.mxu0 }
 0x244   :  { %v580_v23 = vadd.f32 %v955_v15, %v943_v12 }
 0x245   :  { %v571_v20 = vpop.f32.mrf.mxu0 }
 0x246   :  { %v572_v26 = vadd.f32 %v571_v20, %v492_v14 }
 0x24a   :  { %v966_v17 = vpop.f32.mrf.mxu1 }
 0x24b   :  { %v674_v19 = vadd.f32 %v966_v17, %v577_v16 }
 0x24c   :  { %v657_v22 = vpop.f32.mrf.mxu1 }
 0x24d   :  { %v672_v24 = vadd.f32 %v657_v22, %v569_v18  ;;  %v685_v27 = vadd.f32 %v868_v21, %v674_v19 }
 0x24e   :  { %v967_v25 = vpop.f32.mrf.mxu1 }
 0x24f   :  { %v675_v28 = vadd.f32 %v967_v25, %v580_v23  ;;  %v683_v30 = vadd.f32 %v868_v21, %v672_v24  ;;  %v689_v33 = vmax.f32 %v685_v27, 0.0 }
 0x250   :  { %v660_v29 = vpop.f32.mrf.mxu1 }
 0x251   :  { %v686_v31 = vadd.f32 %v868_v21, %v675_v28  ;;  %v673_v32 = vadd.f32 %v660_v29, %v572_v26  ;;  %v687_v40 = vmax.f32 %v683_v30, 0.0 }
 0x253   :  { %v690_v34 = vmax.f32 %v686_v31, 0.0  ;;  %v684_v37 = vadd.f32 %v868_v21, %v673_v32 }
 0x255   :  { %v698_v41 = vadd.f32 %v690_v34, %v689_v33  ;;  %v688_v42 = vmax.f32 %v684_v37, 0.0 }
 0x257   :  { %v699_v43 = vrot.slane %v698_v41, 4  ;;  %v691_v44 = vadd.f32 %v688_v42, %v687_v40 }
 0x259   :  { %v700_v45 = vadd.f32 %v699_v43, %v698_v41  ;;  %v692_v48 = vrot.slane %v691_v44, 4 }
 0x25b   :  { %v701_v49 = vrot.slane %v700_v45, 2  ;;  %v693_v50 = vadd.f32 %v692_v48, %v691_v44 }
 0x25d   :  { %v702_v51 = vadd.f32 %v701_v49, %v700_v45  ;;  %v694_v54 = vrot.slane %v693_v50, 2 }
 0x25f   :  { %v703_v55 = vrot.slane %v702_v51, 1  ;;  %v695_v56 = vadd.f32 %v694_v54, %v693_v50 }
 0x261   :  { %v704_v57 = vadd.f32 %v703_v55, %v702_v51  ;;  %v696_v58 = vrot.slane %v695_v56, 1 }
 0x263   :  { %v706_v38 = vpack.c.bf16 %v704_v57, %v704_v57  ;;  %v697_v59 = vadd.f32 %v696_v58, %v695_v56 }
 0x265   :  { %v705_v60 = vpack.c.bf16 %v697_v59, %v697_v59  ;;  %v733_v61 = vunpack.c.l.b16 %v706_v38 }
 0x267   :  { %v732_v36 = vunpack.c.l.b16 %v705_v60 }
 0x269   :  { %v735_v35 = vsel %vm734_vm6, %v733_v61, %v732_v36 }
 0x26a   :  { %v736_v62 = vpack.c.b16 %v735_v35, %v735_v35 }
 0x26c   :  { %985 = vmatmul.mubr.bf16.vlgmr.msra.gmra.mxu0 %v736_v62 }
 0x32c   :  { %v820_v47 = vpop.f32.mrf.mxu0 }
 0x32d   :  { %v821_v46 = vadd.f32 %v869_v39, %v820_v47 }
 0x32e   :  { %v986_v63 = vpop.f32.mrf.mxu0 }
 0x32f   :  { %826 = vst [vmem:[#allocation7] sm:$0x3] %v821_v46 }
 0x330   :  { %v823_v0 = vpop.f32.mrf.mxu0 }
 0x331   :  { %1072 = shalt.err (!%p1069_p0)
}
 0x332   :  { %836 = dma.vmem_to_hbm [thread:$0]  %s834_s25, 32, %s1343_s13, [#allocation4]   ;;  %v987_v1 = vpop.f32.mrf.mxu0 }
 0x333   :  { %1085 = dma.done.wait [#allocation4], 32  }
 0x334   :  { %1086 = vsyncadd [#allocation4], 4294967264 }
 0x335   :  { %840 = vsyncpa [#allocation3], 1 }
 0x336   :  { %841 = vsyncpa [#allocation6], 1 }
 0x337   :  { %842 = vsyncpa [#allocation4], 1 }

</bundles_post_ra>
